<compile_context>
chip_gen: v7x
topology: tpu7x:2x2x1
jax: 0.10.0
libtpu: 0.0.40
codegen_flags: <defaults>
</compile_context>

<pallas_src>
import functools

import jax
import jax.numpy as jnp
from jax.experimental import pallas as pl
from jax.experimental.pallas import tpu as pltpu

HIDDEN = 1024            # fixed by the module definition
LANE = 128               # TPU lane width
K_TILE_THRESHOLD = 4096  # above this many in_features, tile the K axis
MAX_K_TILE = 2048


def _round_up(v, m):
    return (v + m - 1) // m * m


def _pick_k_tile(f_pad):
    """Largest multiple of 128 (<= MAX_K_TILE) dividing f_pad."""
    for tk in range(MAX_K_TILE, 0, -LANE):
        if f_pad % tk == 0:
            return tk
    return LANE


# ---------------------------------------------------------------------------
# Kernels
# ---------------------------------------------------------------------------
def _fused_kernel(x_ref, w1_ref, b1_ref, w2_ref, b2_ref, out_ref):
    """Whole K axis resident: (x@W1 + b1) -> ReLU -> (@W2 + b2).

    The ReLU intermediate stays a value: bias + ReLU + cast are applied to the
    f32 MXU accumulator and fed straight into the second matmul (no f32 VMEM
    scratch round-trip)."""
    h = jnp.dot(x_ref[...].astype(w1_ref.dtype), w1_ref[...],
                preferred_element_type=jnp.float32)
    h = jnp.maximum(h + b1_ref[...], 0.0).astype(w2_ref.dtype)
    o = jnp.dot(h, w2_ref[...], preferred_element_type=jnp.float32)
    out_ref[...] = (o + b2_ref[...]).astype(out_ref.dtype)


def _ktiled_kernel(x_ref, w1_ref, b1_ref, w2_ref, b2_ref, out_ref, acc_ref):
    """K-tiled variant for large in_features: partial x@W1 products accumulate
    in an f32 VMEM scratch; bias/ReLU/second matmul run on the last K step."""
    k = pl.program_id(1)

    @pl.when(k == 0)
    def _():
        acc_ref[...] = jnp.zeros_like(acc_ref)

    acc_ref[...] += jnp.dot(x_ref[...].astype(w1_ref.dtype), w1_ref[...],
                            preferred_element_type=jnp.float32)

    @pl.when(k == pl.num_programs(1) - 1)
    def _():
        h = jnp.maximum(acc_ref[...] + b1_ref[...], 0.0).astype(w2_ref.dtype)
        o = jnp.dot(h, w2_ref[...], preferred_element_type=jnp.float32)
        out_ref[...] = (o + b2_ref[...]).astype(out_ref.dtype)


# ---------------------------------------------------------------------------
# Wrappers
# ---------------------------------------------------------------------------
def prepare_params(w1, b1, w2, b2, compute_dtype=jnp.bfloat16):
    """One-time weight preparation (call OUTSIDE the per-step jit so the cast /
    pad is not an extra HBM pass on every forward):
      * weights cast to the MXU compute dtype (bf16 by default, f32 accumulation),
      * num_classes padded to a multiple of 128 (lane-dense output stores),
      * in_features padded to a multiple of 128 when the K axis will be tiled.
    Biases stay f32 (added to the f32 accumulator)."""
    f = w1.shape[0]
    c = w2.shape[1]
    assert w1.shape[1] == HIDDEN and w2.shape[0] == HIDDEN

    c_pad = _round_up(c, LANE)
    f_pad = _round_up(f, LANE) if f > K_TILE_THRESHOLD else f

    w1_p = w1.astype(compute_dtype)
    if f_pad != f:
        w1_p = jnp.pad(w1_p, ((0, f_pad - f), (0, 0)))
    w2_p = w2.astype(compute_dtype)
    b2_p = b2.reshape(1, c).astype(jnp.float32)
    if c_pad != c:
        w2_p = jnp.pad(w2_p, ((0, 0), (0, c_pad - c)))
        b2_p = jnp.pad(b2_p, ((0, 0), (0, c_pad - c)))
    b1_p = b1.reshape(1, HIDDEN).astype(jnp.float32)
    return w1_p, b1_p, w2_p, b2_p


@functools.partial(jax.jit, static_argnames=("num_classes", "k_tile"))
def fast_rcnn_predictor(x, w1, b1, w2, b2, *, num_classes, k_tile=None):
    """x: (N, in_features); w1/b1/w2/b2 from prepare_params.
    Returns (N, num_classes) float32."""
    n, f = x.shape
    f_pad = w1.shape[0]
    c_pad = w2.shape[1]

    # ---- Batch tiling: 16-row (bf16 sublane) alignment, minimal padding, and
    # >=2 tiles for moderate N so the "parallel" axis can use both v7x TCs.
    n16 = _round_up(n, 16)
    if n16 <= 64:
        tn, n_pad = n16, n16                       # tiny batch: single tile
    elif n16 <= 512:
        tn = _round_up(n16 // 2, 16)               # two tiles, <32 wasted rows
        n_pad = 2 * tn
    else:
        tn = 256
        n_pad = _round_up(n, tn)
    n_tiles = n_pad // tn

    # ---- K (in_features) tiling for large RoI feature vectors.
    if k_tile is not None:
        tk = k_tile
    elif f_pad > K_TILE_THRESHOLD:
        tk = _pick_k_tile(f_pad)
    else:
        tk = f_pad
    assert f_pad % tk == 0
    k_tiles = f_pad // tk

    # Pad x on the batch rows (and K only if the weights were K-padded).
    # x keeps its original dtype; the bf16 cast happens per tile in-kernel.
    pad_rows, pad_k = n_pad - n, f_pad - f
    x_p = jnp.pad(x, ((0, pad_rows), (0, pad_k))) if (pad_rows or pad_k) else x

    # ---- VMEM budget (reflects actual buffer counts) + generation-aware cap.
    xb = x_p.dtype.itemsize
    wb = w1.dtype.itemsize
    w1_bufs = 1 if k_tiles == 1 else 2             # resident vs pipelined W1
    vmem_need = (
        2 * tn * tk * xb                           # x tile (double-buffered)
        + w1_bufs * tk * HIDDEN * wb               # W1 tile(s)
        + HIDDEN * 4                               # b1 (single buffer)
        + HIDDEN * c_pad * wb                      # W2 (single buffer)
        + c_pad * 4                                # b2 (single buffer)
        + 2 * tn * c_pad * 4                       # out tile (double-buffered)
        + (tn * HIDDEN * 4 if k_tiles > 1 else 0)  # f32 accumulator scratch
    )
    try:
        vmem_cap = pltpu.get_tpu_info().vmem_capacity_bytes
    except Exception:                              # conservative fallback
        vmem_cap = 64 << 20                        # v7x per-TC size
    vmem_bytes = int(min(max(vmem_need + (8 << 20), 32 << 20),
                         vmem_cap - (4 << 20)))

    flops = 2 * n_pad * (f_pad * HIDDEN + HIDDEN * c_pad)
    bytes_accessed = (x_p.size * xb + w1.size * wb + w2.size * wb
                      + b1.size * 4 + b2.size * 4 + n_pad * c_pad * 4)
    cost = pl.CostEstimate(flops=flops, transcendentals=0,
                           bytes_accessed=bytes_accessed)

    out_shape = jax.ShapeDtypeStruct((n_pad, c_pad), jnp.float32)
    resident = pl.Buffered(1)                      # invariant operands: 1 buffer

    if k_tiles == 1:
        out_p = pl.pallas_call(
            _fused_kernel,
            out_shape=out_shape,
            grid_spec=pltpu.PrefetchScalarGridSpec(
                num_scalar_prefetch=0,
                grid=(n_tiles,),
                in_specs=[
                    pl.BlockSpec((tn, f_pad), lambda i: (i, 0)),       # x tile
                    pl.BlockSpec((f_pad, HIDDEN), lambda i: (0, 0),
                                 pipeline_mode=resident),              # W1
                    pl.BlockSpec((1, HIDDEN), lambda i: (0, 0),
                                 pipeline_mode=resident),              # b1
                    pl.BlockSpec((HIDDEN, c_pad), lambda i: (0, 0),
                                 pipeline_mode=resident),              # W2
                    pl.BlockSpec((1, c_pad), lambda i: (0, 0),
                                 pipeline_mode=resident),              # b2
                ],
                out_specs=pl.BlockSpec((tn, c_pad), lambda i: (i, 0)),
            ),
            compiler_params=pltpu.CompilerParams(
                dimension_semantics=("parallel",),
                vmem_limit_bytes=vmem_bytes),
            cost_estimate=cost,
        )(x_p, w1, b1, w2, b2)
    else:
        out_p = pl.pallas_call(
            _ktiled_kernel,
            out_shape=out_shape,
            grid_spec=pltpu.PrefetchScalarGridSpec(
                num_scalar_prefetch=0,
                grid=(n_tiles, k_tiles),
                in_specs=[
                    pl.BlockSpec((tn, tk), lambda i, k: (i, k)),        # x tile
                    pl.BlockSpec((tk, HIDDEN), lambda i, k: (k, 0)),    # W1 tile
                    pl.BlockSpec((1, HIDDEN), lambda i, k: (0, 0),
                                 pipeline_mode=resident),               # b1
                    pl.BlockSpec((HIDDEN, c_pad), lambda i, k: (0, 0),
                                 pipeline_mode=resident),               # W2
                    pl.BlockSpec((1, c_pad), lambda i, k: (0, 0),
                                 pipeline_mode=resident),               # b2
                ],
                out_specs=pl.BlockSpec((tn, c_pad), lambda i, k: (i, 0)),
                scratch_shapes=[pltpu.VMEM((tn, HIDDEN), jnp.float32)],
            ),
            compiler_params=pltpu.CompilerParams(
                dimension_semantics=("parallel", "arbitrary"),
                vmem_limit_bytes=vmem_bytes),
            cost_estimate=cost,
        )(x_p, w1, b1, w2, b2)

    return out_p[:n, :num_classes]


def _reference(x, w1, b1, w2, b2, compute_dtype=jnp.bfloat16):
    """Plain-JAX reference with the same quantization (compute-dtype matmuls,
    f32 accumulation) as the kernel."""
    h = jnp.dot(x.astype(compute_dtype), w1.astype(compute_dtype),
                preferred_element_type=jnp.float32) + b1.reshape(1, -1)
    h = jnp.maximum(h, 0.0)
    return jnp.dot(h.astype(compute_dtype), w2.astype(compute_dtype),
                   preferred_element_type=jnp.float32) + b2.reshape(1, -1)


if __name__ == "__main__":
    root = jax.random.PRNGKey(0)

    def _init_linear(key, fan_in, fan_out):
        """torch.nn.Linear default init; weight already (fan_in, fan_out)."""
        kw, kb = jax.random.split(key)
        bound = 1.0 / float(fan_in) ** 0.5
        w = jax.random.uniform(kw, (fan_in, fan_out), jnp.float32, -bound, bound)
        b = jax.random.uniform(kb, (fan_out,), jnp.float32, -bound, bound)
        return w, b

    # ---- Test 1: small shapes, fused (K-resident) path. ----
    batch, in_features, num_classes = 8, 32, 16
    kx, k1, k2, k3 = jax.random.split(root, 4)
    x = jax.random.normal(kx, (batch, in_features), jnp.float32)
    w1, b1 = _init_linear(k1, in_features, HIDDEN)
    w2, b2 = _init_linear(k2, HIDDEN, num_classes)
    params = prepare_params(w1, b1, w2, b2)
    out = jax.block_until_ready(
        fast_rcnn_predictor(x, *params, num_classes=num_classes))
    ref = _reference(x, w1, b1, w2, b2)
    assert out.shape == (batch, num_classes)
    assert jnp.allclose(out, ref, atol=1e-2, rtol=1e-2), float(
        jnp.max(jnp.abs(out - ref)))

    # ---- Test 2: force the K-tiled + two-batch-tile path (still small). ----
    batch2, in_features2, num_classes2 = 80, 512, 10
    kx2, k12, k22 = jax.random.split(k3, 3)
    x2 = jax.random.normal(kx2, (batch2, in_features2), jnp.float32)
    w1b, b1b = _init_linear(k12, in_features2, HIDDEN)
    w2b, b2b = _init_linear(k22, HIDDEN, num_classes2)
    params2 = prepare_params(w1b, b1b, w2b, b2b)
    out2 = jax.block_until_ready(
        fast_rcnn_predictor(x2, *params2, num_classes=num_classes2, k_tile=128))
    ref2 = _reference(x2, w1b, b1b, w2b, b2b)
    assert out2.shape == (batch2, num_classes2)
    assert jnp.allclose(out2, ref2, atol=1e-2, rtol=1e-2), float(
        jnp.max(jnp.abs(out2 - ref2)))

    print("KERNEL_OK")
</pallas_src>

<mosaic_0001>
module attributes {stable_mosaic.version = 11 : i64} {
  func.func @_fused_kernel(%arg0: i32, %arg1: memref<16x32xf32, #tpu.memory_space<vmem>>, %arg2: memref<32x1024xbf16, #tpu.memory_space<vmem>>, %arg3: memref<1x1024xf32, #tpu.memory_space<vmem>>, %arg4: memref<1024x128xbf16, #tpu.memory_space<vmem>>, %arg5: memref<1x128xf32, #tpu.memory_space<vmem>>, %arg6: memref<16x128xf32, #tpu.memory_space<vmem>>) attributes {dimension_semantics = [#tpu.dimension_semantics<parallel>], iteration_bounds = array<i64: 1>, scalar_prefetch = 0 : i64, scratch_operands = 0 : i64, tpu.core_type = #tpu.core_type<tc>, window_params = [{transform_indices = @transform_0, window_bounds = array<i64: 16, 32>}, {pipeline_mode = #tpu.pipeline_mode<synchronous>, transform_indices = @transform_1, window_bounds = array<i64: 32, 1024>}, {pipeline_mode = #tpu.pipeline_mode<synchronous>, transform_indices = @transform_2, window_bounds = array<i64: 1, 1024>}, {pipeline_mode = #tpu.pipeline_mode<synchronous>, transform_indices = @transform_3, window_bounds = array<i64: 1024, 128>}, {pipeline_mode = #tpu.pipeline_mode<synchronous>, transform_indices = @transform_4, window_bounds = array<i64: 1, 128>}, {transform_indices = @transform_5, window_bounds = array<i64: 16, 128>}]} {
    %c0 = arith.constant 0 : index
    %c0_0 = arith.constant 0 : index
    %0 = vector.load %arg1[%c0, %c0_0] : memref<16x32xf32, #tpu.memory_space<vmem>>, vector<16x32xf32>
    %1 = arith.truncf %0 : vector<16x32xf32> to vector<16x32xbf16>
    %c0_1 = arith.constant 0 : index
    %c0_2 = arith.constant 0 : index
    %2 = vector.load %arg2[%c0_1, %c0_2] : memref<32x1024xbf16, #tpu.memory_space<vmem>>, vector<32x1024xbf16>
    %cst = arith.constant dense<0.000000e+00> : vector<16x1024xf32>
    %3 = tpu.matmul %1, %2, %cst {dimension_numbers = #tpu.dot_dimension_numbers<[1], [0], [0], [1], [0, 0, 1, 1], [], []>} : vector<16x32xbf16>, vector<32x1024xbf16>, vector<16x1024xf32> -> vector<16x1024xf32>
    %c0_3 = arith.constant 0 : index
    %c0_4 = arith.constant 0 : index
    %4 = vector.load %arg3[%c0_3, %c0_4] : memref<1x1024xf32, #tpu.memory_space<vmem>>, vector<1x1024xf32>
    %5 = vector.broadcast %4 : vector<1x1024xf32> to vector<16x1024xf32>
    %6 = arith.addf %3, %5 : vector<16x1024xf32>
    %cst_5 = arith.constant 0.000000e+00 : f32
    %7 = vector.broadcast %cst_5 : f32 to vector<16x1024xf32>
    %8 = arith.maximumf %6, %7 : vector<16x1024xf32>
    %9 = arith.truncf %8 : vector<16x1024xf32> to vector<16x1024xbf16>
    %c0_6 = arith.constant 0 : index
    %c0_7 = arith.constant 0 : index
    %10 = vector.load %arg4[%c0_6, %c0_7] : memref<1024x128xbf16, #tpu.memory_space<vmem>>, vector<1024x128xbf16>
    %cst_8 = arith.constant dense<0.000000e+00> : vector<16x128xf32>
    %11 = tpu.matmul %9, %10, %cst_8 {dimension_numbers = #tpu.dot_dimension_numbers<[1], [0], [0], [1], [0, 0, 1, 1], [], []>} : vector<16x1024xbf16>, vector<1024x128xbf16>, vector<16x128xf32> -> vector<16x128xf32>
    %c0_9 = arith.constant 0 : index
    %c0_10 = arith.constant 0 : index
    %12 = vector.load %arg5[%c0_9, %c0_10] : memref<1x128xf32, #tpu.memory_space<vmem>>, vector<1x128xf32>
    %13 = vector.broadcast %12 : vector<1x128xf32> to vector<16x128xf32>
    %14 = arith.addf %11, %13 : vector<16x128xf32>
    %c0_11 = arith.constant 0 : index
    %c0_12 = arith.constant 0 : index
    %15 = vector.load %arg6[%c0_11, %c0_12] : memref<16x128xf32, #tpu.memory_space<vmem>>, vector<16x128xf32>
    tpu.vector_store %arg6[%c0_11, %c0_12], %14 {strides = array<i32>} : memref<16x128xf32, #tpu.memory_space<vmem>>, vector<16x128xf32>,
    return
  }
  func.func @transform_0(%arg0: i32) -> (i32, i32) {
    %c0_i32 = arith.constant 0 : i32
    %c0_i32_0 = arith.constant 0 : i32
    return %arg0, %c0_i32 : i32, i32
  }
  func.func @transform_1(%arg0: i32) -> (i32, i32) {
    %c0_i32 = arith.constant 0 : i32
    %c0_i32_0 = arith.constant 0 : i32
    %c0_i32_1 = arith.constant 0 : i32
    return %c0_i32, %c0_i32_0 : i32, i32
  }
  func.func @transform_2(%arg0: i32) -> (i32, i32) {
    %c0_i32 = arith.constant 0 : i32
    %c0_i32_0 = arith.constant 0 : i32
    %c0_i32_1 = arith.constant 0 : i32
    return %c0_i32, %c0_i32_0 : i32, i32
  }
  func.func @transform_3(%arg0: i32) -> (i32, i32) {
    %c0_i32 = arith.constant 0 : i32
    %c0_i32_0 = arith.constant 0 : i32
    %c0_i32_1 = arith.constant 0 : i32
    return %c0_i32, %c0_i32_0 : i32, i32
  }
  func.func @transform_4(%arg0: i32) -> (i32, i32) {
    %c0_i32 = arith.constant 0 : i32
    %c0_i32_0 = arith.constant 0 : i32
    %c0_i32_1 = arith.constant 0 : i32
    return %c0_i32, %c0_i32_0 : i32, i32
  }
  func.func @transform_5(%arg0: i32) -> (i32, i32) {
    %c0_i32 = arith.constant 0 : i32
    %c0_i32_0 = arith.constant 0 : i32
    return %arg0, %c0_i32 : i32, i32
  }
}

</mosaic_0001>

<bundles_post_ra>
// kernel: fast_rcnn_predictor.1
= control target key start
LH: loop header
LB: loop body
LE: loop exit
PB: predicated region body
PF: predicated region fallthrough
CT: control target
= control target key end

     0   :  { %10 = vsyncpa [#allocation3], 0  ;;  %s1456_s0 = inlined_call_operand.vmem [shape: f32[16,32], index: 0, kind: input, shape index: {}]   ;;  %s1457_s1 = inlined_call_operand.hbm [shape: bf16[32,1024], index: 1, kind: input, shape index: {}]   ;;  %s1458_s2 = inlined_call_operand.vmem [shape: f32[1,1024], index: 2, kind: input, shape index: {}]   ;;  %s1459_s3 = inlined_call_operand.hbm [shape: bf16[1024,128], index: 3, kind: input, shape index: {}]   ;;  %s1460_s4 = inlined_call_operand.vmem [shape: f32[1,128], index: 4, kind: input, shape index: {}]   ;;  %s1461_s5 = inlined_call_operand.vmem [shape: f32[16,128], index: 5, kind: output, shape index: {}]  }
   0x1   :  { %11 = vsyncpa [#allocation5], 0  ;;  %s1373_s18 = smov [#allocation2]   ;;  %s1325_s22 = scalar_lea.hbm %s1457_s1, 2048 }
   0x2   :  { %s19_s19 = sshll.u32 %s1373_s18, 4  ;;  %p1326_p0 = scmp.ne.s32.totalorder %s1457_s1, %s1325_s22  ;;  %s20_s19 = int_to_ptr.vmem [resolvable:$true] %s19_s19 }
   0x3   :  { %p1329_p1 = scmp.lt.u32.totalorder %s1325_s22, %s1457_s1 }
   0x5   :  { %p1331_p2 = pnand %p1329_p1, %p1326_p0 }
   0x7   :  { %1334 = shalt.err (!%p1331_p2)
}
   0x8   :  { %s1335_s27 = scalar_lea.vmem %s20_s19, 2048  ;;  %p1340_p4 = scmp.lt.s32.totalorder %s20_s19, %s20_s19 }
   0x9   :  { %p1336_p3 = scmp.ne.s32.totalorder %s20_s19, %s1335_s27  ;;  %p1341_p5 = scmp.lt.s32.totalorder %s1335_s27, %s1335_s27 }
   0xb   :  { %p1342_p6 = por %p1341_p5, %p1340_p4 }
   0xd   :  { %p1343_p7 = pnand %p1342_p6, %p1336_p3 }
   0xf   :  { %1346 = shalt.err (!%p1343_p7)
}
  0x10   :  { %s1374_s28 = smov 512   ;;  %s1375_s29 = smov 32  }
  0x11   :  { %25 = dma.hbm_to_vmem [thread:$0]  %s1457_s1, 2048, %s20_s19, [#allocation3], %s1374_s28, %s1374_s28, %s1375_s29  }
  0x12   :  { %s1376_s7 = smov [#allocation4]   ;;  %s1347_s11 = scalar_lea.hbm %s1459_s3, 8192 }
  0x13   :  { %s33_s8 = sshll.u32 %s1376_s7, 4  ;;  %p1348_p8 = scmp.ne.s32.totalorder %s1459_s3, %s1347_s11  ;;  %s34_s8 = int_to_ptr.vmem [resolvable:$true] %s33_s8 }
  0x14   :  { %p1351_p9 = scmp.lt.u32.totalorder %s1347_s11, %s1459_s3 }
  0x16   :  { %p1353_p10 = pnand %p1351_p9, %p1348_p8 }
  0x18   :  { %1356 = shalt.err (!%p1353_p10)
}
  0x19   :  { %s1357_s16 = scalar_lea.vmem %s34_s8, 8192  ;;  %p1362_p12 = scmp.lt.s32.totalorder %s34_s8, %s34_s8 }
  0x1a   :  { %p1358_p11 = scmp.ne.s32.totalorder %s34_s8, %s1357_s16  ;;  %p1363_p13 = scmp.lt.s32.totalorder %s1357_s16, %s1357_s16 }
  0x1c   :  { %p1364_p0 = por %p1363_p13, %p1362_p12 }
  0x1e   :  { %p1365_p1 = pnand %p1364_p0, %p1358_p11 }
  0x20   :  { %1368 = shalt.err (!%p1365_p1)
}
  0x21   :  { %s1377_s1 = smov 64   ;;  %s1378_s17 = smov 4  }
  0x22   :  { %39 = dma.hbm_to_vmem [thread:$0]  %s1459_s3, 8192, %s34_s8, [#allocation5], %s1377_s1, %s1377_s1, %s1378_s17  }
  0x23   :  { %1369 = dma.done.wait [#allocation3], 2048  }
  0x24   :  { %1370 = vsyncadd [#allocation3], 4294965248 }
  0x25   :  { %1371 = dma.done.wait [#allocation5], 8192  }
  0x26   :  { %1372 = vsyncadd [#allocation5], 4294959104  ;;  %v1379_v0 = vmov 0   ;;  %v52_v1 = vld [vmem:[#allocation2] sm:$0xff]  ;;  %v53_v3 = vld [vmem:[#allocation2 + $0x8] sm:$0xff]  ;;  %vm190_vm0 = vcmask 261120  }
  0x27   :  { %226 = vmatprep.mubr.bf16.mxu0 %v1379_v0  ;;  %269 = vmatprep.mubr.bf16.mxu1 %v1379_v0  ;;  %v56_v2 = vld [vmem:[#allocation2 + $0x20] sm:$0xff]  ;;  %v57_v5 = vld [vmem:[#allocation2 + $0x28] sm:$0xff]  ;;  %v54_v16 = vld [vmem:[#allocation2 + $0x10] sm:$0xff] }
  0x28   :  { %v1082_v4 = vcombine.high %v52_v1, %v56_v2  ;;  %v1081_v6 = vcombine.low %v52_v1, %v56_v2  ;;  %v60_v7 = vld [vmem:[#allocation2 + $0x40] sm:$0xff]  ;;  %v1084_v9 = vcombine.high %v53_v3, %v57_v5  ;;  %v1083_v10 = vcombine.low %v53_v3, %v57_v5  ;;  %v61_v12 = vld [vmem:[#allocation2 + $0x48] sm:$0xff]  ;;  %v58_v17 = vld [vmem:[#allocation2 + $0x30] sm:$0xff] }
  0x29   :  { %v64_v8 = vld [vmem:[#allocation2 + $0x60] sm:$0xff]  ;;  %v65_v13 = vld [vmem:[#allocation2 + $0x68] sm:$0xff]  ;;  %v55_v20 = vld [vmem:[#allocation2 + $0x18] sm:$0xff]  ;;  %v1086_v23 = vcombine.high %v54_v16, %v58_v17  ;;  %v1085_v30 = vcombine.low %v54_v16, %v58_v17 }
  0x2a   :  { %v1090_v11 = vcombine.high %v60_v7, %v64_v8  ;;  %194 = vmatprep.subr.bf16.mxu0 %v1082_v4  ;;  %v1092_v14 = vcombine.high %v61_v12, %v65_v13  ;;  %v49_v15 = vld [vmem:[%s1456_s0] sm:$0xff]  ;;  %237 = vmatprep.subr.bf16.mxu1 %v1084_v9  ;;  %v1089_v18 = vcombine.low %v60_v7, %v64_v8  ;;  %v50_v19 = vld [vmem:[%s1456_s0 + $0x8] sm:$0xff]  ;;  %v59_v21 = vld [vmem:[#allocation2 + $0x38] sm:$0xff] }
  0x2b   :  { %195 = vmatpush1.bf16.msra.mxu0 %v1081_v6  ;;  %238 = vmatpush1.bf16.msra.mxu1 %v1083_v10  ;;  %v1091_v22 = vcombine.low %v61_v12, %v65_v13  ;;  %v62_v24 = vld [vmem:[#allocation2 + $0x50] sm:$0xff]  ;;  %v1088_v26 = vcombine.high %v55_v20, %v59_v21  ;;  %v63_v27 = vld [vmem:[#allocation2 + $0x58] sm:$0xff]  ;;  %v51_v28 = vpack.c.bf16 %v50_v19, %v49_v15  ;;  %v1261_v35 = vld [vmem:[#allocation4 + $0x40] sm:$0xff]   ;;  %v70_v6 = vlaneseq }
  0x2c   :  { %196 = vmatprep.subr.bf16.mxu0 %v1090_v11  ;;  %v66_v25 = vld [vmem:[#allocation2 + $0x70] sm:$0xff]  ;;  %239 = vmatprep.subr.bf16.mxu1 %v1092_v14  ;;  %v67_v29 = vld [vmem:[#allocation2 + $0x78] sm:$0xff]  ;;  %v1087_v31 = vcombine.low %v55_v20, %v59_v21  ;;  %v1262_v37 = vld [vmem:[#allocation4 + $0xc0] sm:$0xff]  }
  0x2d   :  { %v1094_v32 = vcombine.high %v62_v24, %v66_v25  ;;  %v1096_v33 = vcombine.high %v63_v27, %v67_v29  ;;  %v1093_v34 = vcombine.low %v62_v24, %v66_v25  ;;  %v1095_v36 = vcombine.low %v63_v27, %v67_v29  ;;  %v1263_v38 = vld [vmem:[#allocation4] sm:$0xff]   ;;  %v1265_v40 = vld [vmem:[#allocation4 + $0x48] sm:$0xff]   ;;  %v1269_v44 = vld [vmem:[#allocation4 + $0x50] sm:$0xff]  }
  0x2e   :  { %v1264_v39 = vld [vmem:[#allocation4 + $0x80] sm:$0xff]   ;;  %v1266_v41 = vld [vmem:[#allocation4 + $0xc8] sm:$0xff]   ;;  %v1270_v45 = vld [vmem:[#allocation4 + $0xd0] sm:$0xff]   ;;  %v71_v7 = vshrl.u32 %v70_v6, 7 }
  0x2f   :  { %197 = vmatpush1.bf16.msra.mxu0 %v1089_v18  ;;  %240 = vmatpush1.bf16.msra.mxu1 %v1091_v22  ;;  %v1267_v42 = vld [vmem:[#allocation4 + $0x8] sm:$0xff]   ;;  %v1271_v46 = vld [vmem:[#allocation4 + $0x10] sm:$0xff]   ;;  %v1273_v48 = vld [vmem:[#allocation4 + $0x58] sm:$0xff]  }
  0x30   :  { %280 = vmatprep.subr.bf16.mxu0 %v1086_v23  ;;  %323 = vmatprep.subr.bf16.mxu1 %v1088_v26  ;;  %v1268_v43 = vld [vmem:[#allocation4 + $0x88] sm:$0xff]   ;;  %v1272_v47 = vld [vmem:[#allocation4 + $0x90] sm:$0xff]   ;;  %v1274_v49 = vld [vmem:[#allocation4 + $0xd8] sm:$0xff]   ;;  %v72_v8 = vsub.s32 0, %v71_v7  ;;  %v80_v10 = vsub.s32 2, %v71_v7  ;;  %v76_v11 = vsub.s32 1, %v71_v7 }
  0x31   :  { %v1275_v50 = vld [vmem:[#allocation4 + $0x18] sm:$0xff]   ;;  %v1277_v52 = vld [vmem:[#allocation4 + $0x60] sm:$0xff]   ;;  %v1281_v56 = vld [vmem:[#allocation4 + $0x68] sm:$0xff]   ;;  %v84_v12 = vsub.s32 3, %v71_v7  ;;  %v88_v17 = vsub.s32 4, %v71_v7  ;;  %v92_v19 = vsub.s32 5, %v71_v7 }
  0x32   :  { %1097 = vmatmul.mubr.msk.bf16.vlgmr.msra.gmra.mrb[0].mxu0 %vm190_vm0, %v51_v28  ;;  %1098 = vmatmul.mubr.msk.bf16.vlgmr.msra.gmra.mrb[0].mxu1 %vm190_vm0, %v51_v28  ;;  %v1276_v51 = vld [vmem:[#allocation4 + $0x98] sm:$0xff]   ;;  %v1278_v53 = vld [vmem:[#allocation4 + $0xe0] sm:$0xff]   ;;  %v1282_v57 = vld [vmem:[#allocation4 + $0xe8] sm:$0xff]   ;;  %v96_v27 = vsub.s32 6, %v71_v7 }
  0x33   :  { %281 = vmatpush1.bf16.msra.mxu0 %v1085_v30  ;;  %324 = vmatpush1.bf16.msra.mxu1 %v1087_v31  ;;  %v1279_v54 = vld [vmem:[#allocation4 + $0x20] sm:$0xff]   ;;  %v1283_v58 = vld [vmem:[#allocation4 + $0x28] sm:$0xff]   ;;  %v1285_v60 = vld [vmem:[#allocation4 + $0x70] sm:$0xff]  }
  0x34   :  { %282 = vmatprep.subr.bf16.mxu0 %v1094_v32  ;;  %325 = vmatprep.subr.bf16.mxu1 %v1096_v33  ;;  %v1280_v55 = vld [vmem:[#allocation4 + $0xa0] sm:$0xff]   ;;  %v1284_v59 = vld [vmem:[#allocation4 + $0xa8] sm:$0xff]   ;;  %v1286_v61 = vld [vmem:[#allocation4 + $0xf0] sm:$0xff]   ;;  %v100_v33 = vsub.s32 7, %v71_v7 }
  0x35   :  { %312 = vmatprep.mubr.bf16.mxu0 %v1379_v0  ;;  %355 = vmatprep.mubr.bf16.mxu1 %v1379_v0  ;;  %v1287_v62 = vld [vmem:[#allocation4 + $0x30] sm:$0xff]   ;;  %v1289_v0 = vld [vmem:[#allocation4 + $0x78] sm:$0xff]   ;;  %v1293_v4 = vld [vmem:[#allocation4 + $0x140] sm:$0xff]  }
  0x36   :  { %v1288_v63 = vld [vmem:[#allocation4 + $0xb0] sm:$0xff]   ;;  %v1290_v1 = vld [vmem:[#allocation4 + $0xf8] sm:$0xff]   ;;  %v1294_v5 = vld [vmem:[#allocation4 + $0x1c0] sm:$0xff]  }
  0x37   :  { %283 = vmatpush1.bf16.msra.mxu0 %v1093_v34  ;;  %326 = vmatpush1.bf16.msra.mxu1 %v1095_v36  ;;  %v1291_v2 = vld [vmem:[#allocation4 + $0x38] sm:$0xff]   ;;  %v68_v9 = vld [vmem:[%s1458_s2] sm:$0xff]  ;;  %v1299_v6 = vld [vmem:[#allocation4 + $0x108] sm:$0xff]  }
  0x38   :  { %1166 = vmatprep.subr.bf16.mxu0 %v1261_v35  ;;  %1188 = vmatprep.subr.bf16.mxu1 %v1262_v37  ;;  %v1292_v3 = vld [vmem:[#allocation4 + $0xb8] sm:$0xff]   ;;  %v73_v13 = vrot.slane %v68_v9, %v72_v8  ;;  %v81_v14 = vrot.slane %v68_v9, %v80_v10  ;;  %v77_v15 = vrot.slane %v68_v9, %v76_v11 }
  0x39   :  { %v85_v16 = vrot.slane %v68_v9, %v84_v12  ;;  %v89_v32 = vrot.slane %v68_v9, %v88_v17  ;;  %v1300_v12 = vld [vmem:[#allocation4 + $0x188] sm:$0xff]   ;;  %v1302_v17 = vld [vmem:[#allocation4 + $0x1d0] sm:$0xff]  }
  0x3a   :  { %1099 = vmatmul.mubr.msk.bf16.vlgmr.msra.gmra.mrb[4].mxu0 %vm190_vm0, %v51_v28  ;;  %1100 = vmatmul.mubr.msk.bf16.vlgmr.msra.gmra.mrb[4].mxu1 %vm190_vm0, %v51_v28 }
  0x3b   :  { %1167 = vmatpush3.bf16.msra.mxu0 %v1263_v38  ;;  %1189 = vmatpush3.bf16.msra.mxu1 %v1264_v39  ;;  %v93_v38 = vrot.slane %v68_v9, %v92_v19 }
  0x3c   :  { %1168 = vmatprep.subr.bf16.mxu0 %v1265_v40  ;;  %1190 = vmatprep.subr.bf16.mxu1 %v1266_v41 }
  0x3f   :  { %1169 = vmatpush3.bf16.msra.mxu0 %v1267_v42  ;;  %1191 = vmatpush3.bf16.msra.mxu1 %v1268_v43 }
  0x40   :  { %1170 = vmatprep.subr.bf16.mxu0 %v1269_v44  ;;  %1192 = vmatprep.subr.bf16.mxu1 %v1270_v45 }
  0x43   :  { %1171 = vmatpush3.bf16.msra.mxu0 %v1271_v46  ;;  %1193 = vmatpush3.bf16.msra.mxu1 %v1272_v47  ;;  %v97_v46 = vrot.slane %v68_v9, %v96_v27 }
  0x44   :  { %1172 = vmatprep.subr.bf16.mxu0 %v1273_v48  ;;  %1194 = vmatprep.subr.bf16.mxu1 %v1274_v49  ;;  %v101_v49 = vrot.slane %v68_v9, %v100_v33  ;;  %v1311_v33 = vld [vmem:[#allocation4 + $0x120] sm:$0xff]  }
  0x47   :  { %1173 = vmatpush3.bf16.msra.mxu0 %v1275_v50  ;;  %1195 = vmatpush3.bf16.msra.mxu1 %v1276_v51 }
  0x48   :  { %1174 = vmatprep.subr.bf16.mxu0 %v1277_v52  ;;  %1196 = vmatprep.subr.bf16.mxu1 %v1278_v53  ;;  %v1295_v52 = vld [vmem:[#allocation4 + $0x100] sm:$0xff]  }
  0x4b   :  { %1175 = vmatpush3.bf16.msra.mxu0 %v1279_v54  ;;  %1197 = vmatpush3.bf16.msra.mxu1 %v1280_v55  ;;  %v1296_v55 = vld [vmem:[#allocation4 + $0x180] sm:$0xff]  }
  0x4c   :  { %1176 = vmatprep.subr.bf16.mxu0 %v1281_v56  ;;  %1198 = vmatprep.subr.bf16.mxu1 %v1282_v57  ;;  %v1297_v56 = vld [vmem:[#allocation4 + $0x148] sm:$0xff]  }
  0x4f   :  { %1177 = vmatpush3.bf16.msra.mxu0 %v1283_v58  ;;  %1199 = vmatpush3.bf16.msra.mxu1 %v1284_v59 }
  0x50   :  { %1178 = vmatprep.subr.bf16.mxu0 %v1285_v60  ;;  %1200 = vmatprep.subr.bf16.mxu1 %v1286_v61  ;;  %v1298_v60 = vld [vmem:[#allocation4 + $0x1c8] sm:$0xff]  }
  0x53   :  { %1179 = vmatpush3.bf16.msra.mxu0 %v1287_v62  ;;  %1201 = vmatpush3.bf16.msra.mxu1 %v1288_v63 }
  0x54   :  { %1180 = vmatprep.subr.bf16.mxu0 %v1289_v0  ;;  %1202 = vmatprep.subr.bf16.mxu1 %v1290_v1 }
  0x57   :  { %1181 = vmatpush3.bf16.msra.mxu0 %v1291_v2  ;;  %1203 = vmatpush3.bf16.msra.mxu1 %v1292_v3 }
  0x58   :  { %1210 = vmatprep.subr.bf16.mxu0 %v1293_v4  ;;  %1232 = vmatprep.subr.bf16.mxu1 %v1294_v5 }
 0x105   :  { %v228_v18 = vpop.f32.mrb[0].mxu0  ;;  %v271_v21 = vpop.f32.mrb[0].mxu1 }
 0x106   :  { %v229_v20 = vadd.f32 %v228_v18, %v73_v13  ;;  %v230_v22 = vpop.f32.mrb[1].mxu0  ;;  %v272_v23 = vadd.f32 %v271_v21, %v81_v14  ;;  %v273_v25 = vpop.f32.mrb[1].mxu1 }
 0x107   :  { %v231_v24 = vadd.f32 %v230_v22, %v77_v15  ;;  %v232_v26 = vpop.f32.mrb[2].mxu0  ;;  %v274_v28 = vadd.f32 %v273_v25, %v85_v16  ;;  %v275_v30 = vpop.f32.mrb[2].mxu1  ;;  %v1303_v22 = vld [vmem:[#allocation4 + $0x110] sm:$0xff]  }
 0x108   :  { %v233_v29 = vadd.f32 %v232_v26, %v73_v13  ;;  %v234_v31 = vpop.f32.mrb[3].mxu0  ;;  %v368_v34 = vmax.f32 %v272_v23, 0.0  ;;  %v276_v35 = vadd.f32 %v275_v30, %v81_v14  ;;  %v277_v37 = vpop.f32.mrb[3].mxu1  ;;  %v366_v39 = vmax.f32 %v229_v20, 0.0  ;;  %v1301_v13 = vld [vmem:[#allocation4 + $0x150] sm:$0xff]   ;;  %v1305_v26 = vld [vmem:[#allocation4 + $0x158] sm:$0xff]  }
 0x109   :  { %v235_v36 = vadd.f32 %v234_v31, %v77_v15  ;;  %v369_v40 = vmax.f32 %v274_v28, 0.0  ;;  %v278_v42 = vadd.f32 %v277_v37, %v85_v16  ;;  %v367_v43 = vmax.f32 %v231_v24, 0.0  ;;  %v1304_v25 = vld [vmem:[#allocation4 + $0x190] sm:$0xff]   ;;  %v1306_v28 = vld [vmem:[#allocation4 + $0x1d8] sm:$0xff]   ;;  %v1309_v31 = vld [vmem:[#allocation4 + $0x160] sm:$0xff]  }
 0x10a   :  { %v374_v41 = vmax.f32 %v233_v29, 0.0  ;;  %v376_v44 = vmax.f32 %v276_v35, 0.0  ;;  %v1307_v29 = vld [vmem:[#allocation4 + $0x118] sm:$0xff]   ;;  %v1313_v35 = vld [vmem:[#allocation4 + $0x168] sm:$0xff]  }
 0x10b   :  { %v375_v45 = vmax.f32 %v235_v36, 0.0  ;;  %v377_v48 = vmax.f32 %v278_v42, 0.0  ;;  %v1308_v30 = vld [vmem:[#allocation4 + $0x198] sm:$0xff]   ;;  %v1314_v36 = vld [vmem:[#allocation4 + $0x1e8] sm:$0xff]   ;;  %v1320_v42 = vld [vmem:[#allocation4 + $0x1b0] sm:$0xff]  }
 0x10c   :  { %v382_v47 = vpack.c.bf16 %v374_v41, %v366_v39  ;;  %v384_v50 = vpack.c.bf16 %v376_v44, %v368_v34  ;;  %v1312_v34 = vld [vmem:[#allocation4 + $0x1a0] sm:$0xff]   ;;  %v1315_v37 = vld [vmem:[#allocation4 + $0x128] sm:$0xff]   ;;  %v1317_v39 = vld [vmem:[#allocation4 + $0x170] sm:$0xff]  }
 0x10d   :  { %v383_v51 = vpack.c.bf16 %v375_v45, %v367_v43  ;;  %v314_v53 = vpop.f32.mrb[4].mxu0  ;;  %v385_v54 = vpack.c.bf16 %v377_v48, %v369_v40  ;;  %v357_v59 = vpop.f32.mrb[4].mxu1  ;;  %v1318_v40 = vld [vmem:[#allocation4 + $0x1f0] sm:$0xff]   ;;  %v1321_v43 = vld [vmem:[#allocation4 + $0x178] sm:$0xff]  }
 0x10e   :  { %v315_v57 = vadd.f32 %v314_v53, %v89_v32  ;;  %v316_v58 = vpop.f32.mrb[5].mxu0  ;;  %v358_v63 = vadd.f32 %v357_v59, %v97_v46  ;;  %v359_v0 = vpop.f32.mrb[5].mxu1  ;;  %v1319_v41 = vld [vmem:[#allocation4 + $0x130] sm:$0xff]   ;;  %v1322_v44 = vld [vmem:[#allocation4 + $0x1f8] sm:$0xff]  }
 0x10f   :  { %941 = vmatprep.mubr.bf16.mxu0 %v383_v51  ;;  %v317_v61 = vadd.f32 %v316_v58, %v93_v38  ;;  %v318_v62 = vpop.f32.mrb[6].mxu0  ;;  %982 = vmatprep.mubr.bf16.mxu1 %v385_v54  ;;  %v360_v4 = vadd.f32 %v359_v0, %v101_v49  ;;  %v361_v5 = vpop.f32.mrb[6].mxu1  ;;  %v1323_v45 = vld [vmem:[#allocation4 + $0x138] sm:$0xff]  }
 0x110   :  { %942 = vmatmul.mubr.bf16.vlgmr.msra.gmra.mrb[8].mxu0 %v382_v47  ;;  %v370_v1 = vmax.f32 %v315_v57, 0.0  ;;  %v319_v2 = vadd.f32 %v318_v62, %v89_v32  ;;  %v320_v3 = vpop.f32.mrb[7].mxu0  ;;  %983 = vmatmul.mubr.bf16.vlgmr.msra.gmra.mrb[8].mxu1 %v384_v50  ;;  %v372_v8 = vmax.f32 %v358_v63, 0.0  ;;  %v362_v10 = vadd.f32 %v361_v5, %v97_v46  ;;  %v363_v11 = vpop.f32.mrb[7].mxu1  ;;  %v1310_v32 = vld [vmem:[#allocation4 + $0x1e0] sm:$0xff]   ;;  %v1324_v46 = vld [vmem:[#allocation4 + $0x1b8] sm:$0xff]  }
 0x111   :  { %1211 = vmatpush3.bf16.msra.mxu0 %v1295_v52  ;;  %v371_v7 = vmax.f32 %v317_v61, 0.0  ;;  %v321_v9 = vadd.f32 %v320_v3, %v93_v38  ;;  %1233 = vmatpush3.bf16.msra.mxu1 %v1296_v55  ;;  %v373_v15 = vmax.f32 %v360_v4, 0.0  ;;  %v364_v16 = vadd.f32 %v363_v11, %v101_v49  ;;  %v1316_v38 = vld [vmem:[#allocation4 + $0x1a8] sm:$0xff]   ;;  %v1101_v49 = vld [vmem:[%s1460_s4] ss:$0 sm:$0xff] }
 0x112   :  { %1212 = vmatprep.subr.bf16.mxu0 %v1297_v56  ;;  %v378_v14 = vmax.f32 %v319_v2, 0.0  ;;  %1234 = vmatprep.subr.bf16.mxu1 %v1298_v60  ;;  %v380_v19 = vmax.f32 %v362_v10, 0.0 }
 0x113   :  { %v379_v18 = vmax.f32 %v321_v9, 0.0  ;;  %v381_v21 = vmax.f32 %v364_v16, 0.0 }
 0x114   :  { %v386_v20 = vpack.c.bf16 %v378_v14, %v370_v1  ;;  %v388_v24 = vpack.c.bf16 %v380_v19, %v372_v8 }
 0x115   :  { %1213 = vmatpush3.bf16.msra.mxu0 %v1299_v6  ;;  %v387_v23 = vpack.c.bf16 %v379_v18, %v371_v7  ;;  %1235 = vmatpush3.bf16.msra.mxu1 %v1300_v12  ;;  %v389_v27 = vpack.c.bf16 %v381_v21, %v373_v15 }
 0x116   :  { %1214 = vmatprep.subr.bf16.mxu0 %v1301_v13  ;;  %1236 = vmatprep.subr.bf16.mxu1 %v1302_v17 }
 0x117   :  { %1023 = vmatprep.mubr.bf16.mxu0 %v387_v23  ;;  %1064 = vmatprep.mubr.bf16.mxu1 %v389_v27 }
 0x119   :  { %1215 = vmatpush3.bf16.msra.mxu0 %v1303_v22  ;;  %1237 = vmatpush3.bf16.msra.mxu1 %v1304_v25 }
 0x11a   :  { %1216 = vmatprep.subr.bf16.mxu0 %v1305_v26  ;;  %1238 = vmatprep.subr.bf16.mxu1 %v1306_v28 }
 0x11d   :  { %1217 = vmatpush3.bf16.msra.mxu0 %v1307_v29  ;;  %1239 = vmatpush3.bf16.msra.mxu1 %v1308_v30 }
 0x11e   :  { %1218 = vmatprep.subr.bf16.mxu0 %v1309_v31  ;;  %1240 = vmatprep.subr.bf16.mxu1 %v1310_v32 }
 0x121   :  { %1219 = vmatpush3.bf16.msra.mxu0 %v1311_v33  ;;  %1241 = vmatpush3.bf16.msra.mxu1 %v1312_v34 }
 0x122   :  { %1220 = vmatprep.subr.bf16.mxu0 %v1313_v35  ;;  %1242 = vmatprep.subr.bf16.mxu1 %v1314_v36 }
 0x125   :  { %1221 = vmatpush3.bf16.msra.mxu0 %v1315_v37  ;;  %1243 = vmatpush3.bf16.msra.mxu1 %v1316_v38 }
 0x126   :  { %1222 = vmatprep.subr.bf16.mxu0 %v1317_v39  ;;  %1244 = vmatprep.subr.bf16.mxu1 %v1318_v40 }
 0x129   :  { %1223 = vmatpush3.bf16.msra.mxu0 %v1319_v41  ;;  %1245 = vmatpush3.bf16.msra.mxu1 %v1320_v42 }
 0x12a   :  { %1224 = vmatprep.subr.bf16.mxu0 %v1321_v43  ;;  %1246 = vmatprep.subr.bf16.mxu1 %v1322_v44 }
 0x12d   :  { %1225 = vmatpush3.bf16.msra.mxu0 %v1323_v45  ;;  %1247 = vmatpush3.bf16.msra.mxu1 %v1324_v46 }
 0x130   :  { %1024 = vmatmul.mubr.bf16.vlgmr.msra.gmra.mrb[12].mxu0 %v386_v20  ;;  %1065 = vmatmul.mubr.bf16.vlgmr.msra.gmra.mrb[12].mxu1 %v388_v24 }
 0x1e3   :  { %v1182_v47 = vpop.f32.mrb[8].mxu0  ;;  %v1204_v48 = vpop.f32.mrb[8].mxu1 }
 0x1e4   :  { %v1183_v50 = vpop.f32.mrb[9].mxu0  ;;  %v1205_v52 = vpop.f32.mrb[9].mxu1 }
 0x1e5   :  { %v1184_v51 = vadd.f32 %v1183_v50, %v1182_v47  ;;  %v1185_v53 = vpop.f32.mrb[10].mxu0  ;;  %v1206_v54 = vadd.f32 %v1205_v52, %v1204_v48  ;;  %v1207_v55 = vpop.f32.mrb[10].mxu1 }
 0x1e6   :  { %v1186_v56 = vpop.f32.mrb[11].mxu0  ;;  %v1208_v59 = vpop.f32.mrb[11].mxu1 }
 0x1e7   :  { %v944_v57 = vadd.f32 %v1184_v51, %v1101_v49  ;;  %v1187_v58 = vadd.f32 %v1186_v56, %v1185_v53  ;;  %v1209_v60 = vadd.f32 %v1208_v59, %v1207_v55 }
 0x1e9   :  { %v985_v61 = vadd.f32 %v1206_v54, %v944_v57  ;;  %v947_v62 = vadd.f32 %v1187_v58, %v1101_v49 }
 0x1eb   :  { %v988_v63 = vadd.f32 %v1209_v60, %v947_v62 }
 0x203   :  { %v1226_v0 = vpop.f32.mrb[12].mxu0  ;;  %v1248_v1 = vpop.f32.mrb[12].mxu1 }
 0x204   :  { %v1227_v2 = vpop.f32.mrb[13].mxu0  ;;  %v1249_v4 = vpop.f32.mrb[13].mxu1 }
 0x205   :  { %v1228_v3 = vadd.f32 %v1227_v2, %v1226_v0  ;;  %v1229_v5 = vpop.f32.mrb[14].mxu0  ;;  %v1250_v6 = vadd.f32 %v1249_v4, %v1248_v1  ;;  %v1251_v7 = vpop.f32.mrb[14].mxu1 }
 0x206   :  { %v1230_v8 = vpop.f32.mrb[15].mxu0  ;;  %v1252_v11 = vpop.f32.mrb[15].mxu1 }
 0x207   :  { %v1026_v9 = vadd.f32 %v1228_v3, %v985_v61  ;;  %v1231_v10 = vadd.f32 %v1230_v8, %v1229_v5  ;;  %v1253_v12 = vadd.f32 %v1252_v11, %v1251_v7 }
 0x209   :  { %v1067_v13 = vadd.f32 %v1250_v6, %v1026_v9  ;;  %v1029_v14 = vadd.f32 %v1231_v10, %v988_v63 }
 0x20b   :  { %1073 = vst [vmem:[%s1461_s5] sm:$0xff] %v1067_v13  ;;  %v1070_v15 = vadd.f32 %v1253_v12, %v1029_v14 }
 0x20d   :  { %1074 = vst [vmem:[%s1461_s5 + $0x8] sm:$0xff] %v1070_v15 }
 0x20e   :  { %1079 = vsyncpa [#allocation3], 1 }
 0x20f   :  { %1080 = vsyncpa [#allocation5], 1 }

</bundles_post_ra>
